<compile_context>
chip_gen: v7x
topology: tpu7x:2x2x1
jax: 0.10.0
libtpu: 0.0.40
codegen_flags: <defaults>
</compile_context>

<pallas_src>
import jax
import jax.numpy as jnp
import numpy as np
from jax.experimental import pallas as pl
from jax.experimental.pallas import tpu as pltpu


def _linear_add_kernel(x1_ref, x2_ref, o_ref):
    """x1: (1, K) row;  x2: (N, K) with N == K;  o: (N, K)."""
    x1_row = x1_ref[...]                                   # (1, K)
    x2 = x2_ref[...]                                       # (N, K)

    # VPU GEMV against the native x2 layout:
    #   prod[n, k] = x1[0, k] * x2[n, k]    (sublane broadcast of the row)
    prod = x1_row * x2                                     # (N, K)

    # Cross-lane (XLU) reduction: v1_col[n, 0] = sum_k prod[n, k] = v1[0, n]
    v1_col = jnp.sum(prod, axis=1, keepdims=True)          # (N, 1)

    # In-kernel column -> row relayout via one-hot contraction:
    #   v1_row[0, j] = sum_n v1_col[n, 0] * (n == j)
    # (lane-broadcast of the column + sublane reduce; lowers for any N).
    n = x2.shape[0]
    rows = jax.lax.broadcasted_iota(jnp.int32, (n, n), 0)
    cols = jax.lax.broadcasted_iota(jnp.int32, (n, n), 1)
    v1_row = jnp.sum(jnp.where(rows == cols, v1_col, 0.0),
                     axis=0, keepdims=True)                # (1, N)

    # v2 = v1 + x2 : row broadcast over sublanes, x2 stays in native layout.
    o_ref[...] = (x2 + v1_row).astype(o_ref.dtype)


@jax.jit
def linear_add(x1, x2):
    """x1: (1, K), x2: (N, K) with N == K (so the torch broadcast is valid)."""
    M, K = x1.shape
    N, K2 = x2.shape
    assert K == K2, "linear contraction dims must match"
    assert M == 1 and N == K, "broadcast of (M,N)+(N,K) requires M==1 and N==K"
    # Untiled, fully VMEM-resident path; keeps ~3*N^2 f32 well under the v5e
    # 16 MiB scoped-VMEM default.  Larger N=K needs the tiled variant (TODO).
    assert N <= 512, "untiled path is for small shapes; tile for larger N=K"

    f32 = jnp.float32
    x1 = x1.astype(f32)
    x2 = x2.astype(f32)

    vmem = pltpu.MemorySpace.VMEM
    return pl.pallas_call(
        _linear_add_kernel,
        out_shape=jax.ShapeDtypeStruct((N, K), f32),
        in_specs=[
            pl.BlockSpec(memory_space=vmem),   # x1 row
            pl.BlockSpec(memory_space=vmem),   # x2 (single, native layout)
        ],
        out_specs=pl.BlockSpec(memory_space=vmem),
        # Reuse the x2 HBM slab for the output (same shape/dtype).
        input_output_aliases={1: 0},
        cost_estimate=pl.CostEstimate(
            flops=2 * N * K + N * K,                # GEMV + broadcast add
            transcendentals=0,
            bytes_accessed=4 * (K + 2 * N * K),     # x1 + x2 in, out
        ),
    )(x1, x2)


def _reference(x1, x2):
    x1_64 = np.asarray(x1, dtype=np.float64)
    x2_64 = np.asarray(x2, dtype=np.float64)
    return x1_64 @ x2_64.T + x2_64


if __name__ == "__main__":
    key = jax.random.PRNGKey(0)
    k1, k2 = jax.random.split(key)

    # Shapes consistent with the module: x1 is a single row (the module's
    # literal is (1, 3)); x2 is a square "weight" so the (1, N) + (N, K)
    # broadcast in `v1 + x2` is valid.
    for k_dim in (3, 32, 128):      # 3 = the module's literal size
        x1 = jax.random.normal(k1, (1, k_dim), dtype=jnp.float32)
        x2 = jax.random.normal(k2, (k_dim, k_dim), dtype=jnp.float32)

        out = jax.block_until_ready(linear_add(x1, x2))
        ref = _reference(x1, x2)

        assert out.shape == (k_dim, k_dim)
        assert np.allclose(np.asarray(out), ref, atol=2e-4, rtol=1e-5), k_dim

    print("KERNEL_OK")
</pallas_src>

<mosaic_0001>
module attributes {stable_mosaic.version = 11 : i64} {
  func.func @_linear_add_kernel(%arg0: memref<1x3xf32, #tpu.memory_space<vmem>>, %arg1: memref<3x3xf32, #tpu.memory_space<vmem>>, %arg2: memref<3x3xf32, #tpu.memory_space<vmem>>) attributes {dimension_semantics = [], scalar_prefetch = 0 : i64, scratch_operands = 0 : i64, tpu.core_type = #tpu.core_type<tc>} {
    %c0 = arith.constant 0 : index
    %c0_0 = arith.constant 0 : index
    %0 = vector.load %arg0[%c0, %c0_0] : memref<1x3xf32, #tpu.memory_space<vmem>>, vector<1x3xf32>
    %c0_1 = arith.constant 0 : index
    %c0_2 = arith.constant 0 : index
    %1 = vector.load %arg1[%c0_1, %c0_2] : memref<3x3xf32, #tpu.memory_space<vmem>>, vector<3x3xf32>
    %2 = vector.broadcast %0 : vector<1x3xf32> to vector<3x3xf32>
    %3 = arith.mulf %2, %1 : vector<3x3xf32>
    %cst = arith.constant dense<0.000000e+00> : vector<3xf32>
    %4 = vector.multi_reduction <add>, %3, %cst [1] : vector<3x3xf32> to vector<3xf32>
    %5 = vector.shape_cast %4 : vector<3xf32> to vector<3x1xf32>
    %6 = tpu.iota {dimensions = array<i32: 0>} : vector<3x3xi32>
    %7 = tpu.iota {dimensions = array<i32: 1>} : vector<3x3xi32>
    %8 = arith.cmpi eq, %6, %7 : vector<3x3xi32>
    %cst_3 = arith.constant 0.000000e+00 : f32
    %9 = vector.shape_cast %5 : vector<3x1xf32> to vector<3x1xf32>
    %10 = vector.broadcast %9 : vector<3x1xf32> to vector<3x3xf32>
    %11 = vector.broadcast %cst_3 : f32 to vector<3x3xf32>
    %12 = arith.select %8, %10, %11 : vector<3x3xi1>, vector<3x3xf32>
    %cst_4 = arith.constant dense<0.000000e+00> : vector<3xf32>
    %13 = vector.multi_reduction <add>, %12, %cst_4 [0] : vector<3x3xf32> to vector<3xf32>
    %14 = vector.shape_cast %13 : vector<3xf32> to vector<1x3xf32>
    %15 = vector.broadcast %14 : vector<1x3xf32> to vector<3x3xf32>
    %16 = arith.addf %1, %15 : vector<3x3xf32>
    %c0_5 = arith.constant 0 : index
    %c0_6 = arith.constant 0 : index
    %17 = vector.load %arg2[%c0_5, %c0_6] : memref<3x3xf32, #tpu.memory_space<vmem>>, vector<3x3xf32>
    tpu.vector_store %arg2[%c0_5, %c0_6], %16 {strides = array<i32>} : memref<3x3xf32, #tpu.memory_space<vmem>>, vector<3x3xf32>,
    return
  }
}

</mosaic_0001>

<bundles_post_ra>
// kernel: linear_add.1
= control target key start
LH: loop header
LB: loop body
LE: loop exit
PB: predicated region body
PF: predicated region fallthrough
CT: control target
= control target key end

     0   :  { %7 = vsyncpa [#allocation3], 0  ;;  %s165_s0 = inlined_call_operand.vmem [shape: f32[1,3], index: 0, kind: input, shape index: {}]   ;;  %s166_s1 = inlined_call_operand.hbm [shape: f32[3,3], index: 1, kind: input, shape index: {}, may-alias: {1,2}]   ;;  %s167_s2 = inlined_call_operand.hbm [shape: f32[3,3], index: 2, kind: output, shape index: {}, may-alias: {1,2}]  }
   0x1   :  { %8 = vsyncpa [#allocation4], 0  ;;  %s118_s9 = smov [#allocation2]   ;;  %s70_s13 = scalar_lea.hbm %s166_s1, 64 }
   0x2   :  { %s17_s10 = sshll.u32 %s118_s9, 4  ;;  %p71_p0 = scmp.ne.s32.totalorder %s166_s1, %s70_s13  ;;  %s18_s10 = int_to_ptr.vmem [resolvable:$true] %s17_s10 }
   0x3   :  { %p74_p1 = scmp.lt.u32.totalorder %s70_s13, %s166_s1 }
   0x5   :  { %p76_p2 = pnand %p74_p1, %p71_p0 }
   0x7   :  { %79 = shalt.err (!%p76_p2)
}
   0x8   :  { %s80_s18 = scalar_lea.vmem %s18_s10, 64  ;;  %p85_p4 = scmp.lt.s32.totalorder %s18_s10, %s18_s10 }
   0x9   :  { %p81_p3 = scmp.ne.s32.totalorder %s18_s10, %s80_s18  ;;  %p86_p5 = scmp.lt.s32.totalorder %s80_s18, %s80_s18 }
   0xb   :  { %p87_p6 = por %p86_p5, %p85_p4 }
   0xd   :  { %p88_p7 = pnand %p87_p6, %p81_p3 }
   0xf   :  { %91 = shalt.err (!%p88_p7)
}
  0x10   :  { %20 = dma.hbm_to_vmem [thread:$0]  %s166_s1, 64, %s18_s10, [#allocation3]  }
  0x11   :  { %114 = dma.done.wait [#allocation3], 64  }
  0x12   :  { %115 = vsyncadd [#allocation3], 4294967232  ;;  %v67_v0 = vld [vmem:[%s165_s0] ss:$0 sm:$0xff]  ;;  %vm33_vm0 = vcmask 18432   ;;  %v37_v4 = vlaneseq  ;;  %s119_s0 = smov [#allocation5]  }
  0x13   :  { %v25_v1 = vld [vmem:[#allocation2] sm:$0x7]  ;;  %s58_s1 = sshll.u32 %s119_s0, 4  ;;  %s59_s1 = int_to_ptr.vmem [resolvable:$true] %s58_s1 }
  0x14   :  { %v32_v2 = vmul.f32 %v67_v0, %v25_v1  ;;  %v38_v5 = vshrl.u32 %v37_v4, 7  ;;  %v40_v6 = vand.u32 127, %v37_v4  ;;  %s92_s23 = scalar_lea.vmem %s59_s1, 64  ;;  %p97_p9 = scmp.lt.s32.totalorder %s59_s1, %s59_s1 }
  0x15   :  { %p93_p8 = scmp.ne.s32.totalorder %s59_s1, %s92_s23  ;;  %p98_p10 = scmp.lt.s32.totalorder %s92_s23, %s92_s23 }
  0x16   :  { %v34_v3 = vsel %vm33_vm0, %v32_v2, 0.0  ;;  %vm41_vm1 = vcmp.eq.s32.totalorder %v38_v5, %v40_v6 }
  0x17   :  { %35 = vadd.xlane.f32.xlu0 %v34_v3  ;;  %p99_p11 = por %p98_p10, %p97_p9 }
  0x19   :  { %p100_p12 = pnand %p99_p11, %p93_p8 }
  0xa4   :  { %v36_v7 = vpop.xlane.xlu0 %35 }
  0xa5   :  { %v42_v8 = vsel %vm41_vm1, %v36_v7, 0.0 }
  0xa6   :  { %v43_v9 = vsel %vm33_vm0, %v42_v8, 0.0 }
  0xa7   :  { %v44_v10 = vrot.slane %v43_v9, 4 }
  0xa9   :  { %v45_v11 = vadd.f32 %v44_v10, %v43_v9 }
  0xab   :  { %v46_v12 = vrot.slane %v45_v11, 2 }
  0xad   :  { %v47_v13 = vadd.f32 %v46_v12, %v45_v11 }
  0xaf   :  { %v48_v14 = vrot.slane %v47_v13, 1 }
  0xb1   :  { %v49_v15 = vadd.f32 %v48_v14, %v47_v13 }
  0xb3   :  { %v50_v16 = vadd.f32 %v49_v15, %v25_v1 }
  0xb5   :  { %51 = vst.msk [vmem:[#allocation5] sm:$0x7] %vm33_vm0, %v50_v16 }
  0xb6   :  { %103 = shalt.err (!%p100_p12)
}
  0xb7   :  { %s104_s26 = scalar_lea.hbm %s167_s2, 64 }
  0xb8   :  { %p105_p13 = scmp.ne.s32.totalorder %s167_s2, %s104_s26  ;;  %p108_p0 = scmp.lt.u32.totalorder %s104_s26, %s167_s2 }
  0xba   :  { %p110_p1 = pnand %p108_p0, %p105_p13 }
  0xbc   :  { %113 = shalt.err (!%p110_p1)
}
  0xbd   :  { %61 = dma.vmem_to_hbm [thread:$0]  %s59_s1, 64, %s167_s2, [#allocation4]  }
  0xbe   :  { %116 = dma.done.wait [#allocation4], 64  }
  0xbf   :  { %117 = vsyncadd [#allocation4], 4294967232 }
  0xc0   :  { %65 = vsyncpa [#allocation3], 1 }
  0xc1   :  { %66 = vsyncpa [#allocation4], 1 }

</bundles_post_ra>
